<compile_context>
chip_gen: v7x
topology: tpu7x:2x2x1
jax: 0.10.0
libtpu: 0.0.40
codegen_flags: <defaults>
</compile_context>

<pallas_src>
import functools

import jax
import jax.numpy as jnp
from jax.experimental import pallas as pl
from jax.experimental.pallas import tpu as pltpu

PAD = 128  # lane width: hidden/output feature dims are padded to this


def _round_up(n, m):
    return ((n + m - 1) // m) * m


def policy_net_kernel(x_ref, w_ref, b_ref, o_ref, *, sd_pad, action_bound):
    """x_ref: (TB, sd_pad) f32; w_ref: (3*PAD, PAD) bf16; b_ref: (8, PAD) f32;
    o_ref: (TB, PAD) f32."""
    # Cast activations to bf16 only at the MXU inputs; accumulate in f32.
    x = x_ref[...].astype(jnp.bfloat16)

    # Static slices into the resident parameter slabs (zero-cost views).
    w1 = w_ref[0:sd_pad, :]          # only the real state rows are contracted
    w2 = w_ref[PAD:2 * PAD, :]
    w3 = w_ref[2 * PAD:3 * PAD, :]
    b1 = b_ref[0:1, :]
    b2 = b_ref[1:2, :]
    b3 = b_ref[2:3, :]

    # fc1 + relu   (padded lanes stay exactly zero: zero W cols + zero bias)
    h1 = jnp.maximum(
        jnp.dot(x, w1, preferred_element_type=jnp.float32) + b1, 0.0)
    # fc2 + relu
    h2 = jnp.maximum(
        jnp.dot(h1.astype(jnp.bfloat16), w2,
                preferred_element_type=jnp.float32) + b2, 0.0)
    # fc3 + tanh, action_bound folded into the epilogue
    h3 = jnp.dot(h2.astype(jnp.bfloat16), w3,
                 preferred_element_type=jnp.float32) + b3
    o_ref[...] = jnp.tanh(h3) * action_bound


def pack_params(params, state_dim, hidden_dim, action_dim):
    """Pack 3 weights + 3 biases into a bf16 weight slab and an f32 bias slab.

    Weights are stored (in_features, out_features), i.e. transposed vs
    PyTorch's (out, in), so the kernel computes x @ W + b directly.
    """
    assert state_dim <= PAD and hidden_dim <= PAD and action_dim <= PAD
    w1, b1, w2, b2, w3, b3 = params

    w_slab = jnp.zeros((3 * PAD, PAD), jnp.float32)
    w_slab = w_slab.at[0:state_dim, 0:hidden_dim].set(w1)
    w_slab = w_slab.at[PAD:PAD + hidden_dim, 0:hidden_dim].set(w2)
    w_slab = w_slab.at[2 * PAD:2 * PAD + hidden_dim, 0:action_dim].set(w3)
    w_slab = w_slab.astype(jnp.bfloat16)          # half the DMA / resident VMEM

    b_slab = jnp.zeros((8, PAD), jnp.float32)     # 8 rows: sublane-aligned
    b_slab = b_slab.at[0, 0:hidden_dim].set(b1.reshape(-1))
    b_slab = b_slab.at[1, 0:hidden_dim].set(b2.reshape(-1))
    b_slab = b_slab.at[2, 0:action_dim].set(b3.reshape(-1))
    return w_slab, b_slab


@functools.partial(jax.jit, static_argnames=("action_bound", "action_dim"))
def policy_net_forward(x, w_slab, b_slab, *, action_bound, action_dim):
    """x: (B, state_dim) f32. Returns (B, action_dim) f32."""
    B, state_dim = x.shape
    sd_pad = _round_up(state_dim, 16)   # bf16 sublane packing for the w1 slice

    # Batch tiling: one tile for tiny batches; otherwise >= 2 grid steps so
    # the "parallel" batch axis can use both v7x TensorCores, capped at 1024
    # rows/tile (512-1024-row tiles reach ~85% of HBM roofline vs ~63% at 256
    # and amortize the ~0.35us per-grid-step overhead).
    if B <= 16:
        tb = _round_up(B, 8)
    else:
        tb = min(1024, _round_up((B + 1) // 2, 8))
    b_pad = _round_up(B, tb)

    if (b_pad, sd_pad) != (B, state_dim):
        x = jnp.pad(x, ((0, b_pad - B), (0, sd_pad - state_dim)))

    kernel = functools.partial(policy_net_kernel, sd_pad=sd_pad,
                               action_bound=float(action_bound))

    flops = 2 * b_pad * (sd_pad * PAD + PAD * PAD + PAD * PAD)
    bytes_accessed = (b_pad * sd_pad * 4          # x (f32)
                      + w_slab.size * 2           # weight slab (bf16)
                      + b_slab.size * 4           # bias slab (f32)
                      + b_pad * PAD * 4)          # output (f32)
    cost = pl.CostEstimate(flops=flops,
                           transcendentals=b_pad * PAD,   # tanh
                           bytes_accessed=bytes_accessed)

    out_pad = pl.pallas_call(
        kernel,
        out_shape=jax.ShapeDtypeStruct((b_pad, PAD), jnp.float32),
        grid_spec=pltpu.PrefetchScalarGridSpec(
            num_scalar_prefetch=0,
            grid=(b_pad // tb,),
            in_specs=[
                # activations: tiled over the batch grid axis, native lane width
                pl.BlockSpec((tb, sd_pad), lambda i: (i, 0)),
                # weight slab: constant block index -> fetched once, resident
                pl.BlockSpec((3 * PAD, PAD), lambda i: (0, 0)),
                # bias slab: constant block index -> fetched once, resident
                pl.BlockSpec((8, PAD), lambda i: (0, 0)),
            ],
            out_specs=pl.BlockSpec((tb, PAD), lambda i: (i, 0)),
        ),
        compiler_params=pltpu.CompilerParams(
            dimension_semantics=("parallel",)),
        cost_estimate=cost,
    )(x, w_slab, b_slab)

    # slice the zero-padded rows / lanes back off outside the kernel
    return out_pad[:B, :action_dim]


def xavier_uniform(key, fan_in, fan_out):
    # matches torch.nn.init.xavier_uniform_ (gain=1)
    limit = jnp.sqrt(6.0 / (fan_in + fan_out))
    return jax.random.uniform(key, (fan_in, fan_out), jnp.float32,
                              minval=-limit, maxval=limit)


def init_params(key, state_dim, hidden_dim, action_dim):
    k1, k2, k3 = jax.random.split(key, 3)
    w1 = xavier_uniform(k1, state_dim, hidden_dim)
    b1 = jnp.zeros((1, hidden_dim), jnp.float32)
    w2 = xavier_uniform(k2, hidden_dim, hidden_dim)
    b2 = jnp.zeros((1, hidden_dim), jnp.float32)
    w3 = xavier_uniform(k3, hidden_dim, action_dim)
    b3 = jnp.zeros((1, action_dim), jnp.float32)
    return (w1, b1, w2, b2, w3, b3)


if __name__ == "__main__":
    batch, state_dim, hidden_dim, action_dim = 8, 16, 32, 4
    action_bound = 2.0

    key = jax.random.PRNGKey(0)
    k_x, k_p = jax.random.split(key)
    x = jax.random.normal(k_x, (batch, state_dim), jnp.float32)
    params = init_params(k_p, state_dim, hidden_dim, action_dim)

    # pack once (outside the hot path), then run the kernel
    w_slab, b_slab = pack_params(params, state_dim, hidden_dim, action_dim)
    out = policy_net_forward(x, w_slab, b_slab,
                             action_bound=action_bound, action_dim=action_dim)
    out = jax.block_until_ready(out)

    # Reference in plain JAX with the same bf16-in / f32-accumulate matmul
    # precision as the kernel (padded lanes contribute exact zeros).
    w1, b1, w2, b2, w3, b3 = params

    def bdot(a, w):
        return jnp.dot(a.astype(jnp.bfloat16), w.astype(jnp.bfloat16),
                       preferred_element_type=jnp.float32)

    h = jnp.maximum(bdot(x, w1) + b1, 0.0)
    h = jnp.maximum(bdot(h, w2) + b2, 0.0)
    ref = jnp.tanh(bdot(h, w3) + b3) * action_bound

    assert out.shape == (batch, action_dim)
    assert jnp.allclose(out, ref, atol=1e-3, rtol=1e-3), "mismatch vs reference"

    print("KERNEL_OK")
</pallas_src>

<mosaic_0001>
module attributes {stable_mosaic.version = 11 : i64} {
  func.func @policy_net_kernel(%arg0: i32, %arg1: memref<8x16xf32, #tpu.memory_space<vmem>>, %arg2: memref<384x128xbf16, #tpu.memory_space<vmem>>, %arg3: memref<8x128xf32, #tpu.memory_space<vmem>>, %arg4: memref<8x128xf32, #tpu.memory_space<vmem>>) attributes {dimension_semantics = [#tpu.dimension_semantics<parallel>], iteration_bounds = array<i64: 1>, scalar_prefetch = 0 : i64, scratch_operands = 0 : i64, tpu.core_type = #tpu.core_type<tc>, window_params = [{transform_indices = @transform_0, window_bounds = array<i64: 8, 16>}, {pipeline_mode = #tpu.pipeline_mode<synchronous>, transform_indices = @transform_1, window_bounds = array<i64: 384, 128>}, {pipeline_mode = #tpu.pipeline_mode<synchronous>, transform_indices = @transform_2, window_bounds = array<i64: 8, 128>}, {transform_indices = @transform_3, window_bounds = array<i64: 8, 128>}]} {
    %c0 = arith.constant 0 : index
    %c0_0 = arith.constant 0 : index
    %0 = vector.load %arg1[%c0, %c0_0] : memref<8x16xf32, #tpu.memory_space<vmem>>, vector<8x16xf32>
    %1 = arith.truncf %0 : vector<8x16xf32> to vector<8x16xbf16>
    %c0_1 = arith.constant 0 : index
    %c0_2 = arith.constant 0 : index
    %2 = vector.load %arg2[%c0_1, %c0_2] : memref<384x128xbf16, #tpu.memory_space<vmem>>, vector<16x128xbf16>
    %c128 = arith.constant 128 : index
    %c0_3 = arith.constant 0 : index
    %3 = vector.load %arg2[%c128, %c0_3] : memref<384x128xbf16, #tpu.memory_space<vmem>>, vector<128x128xbf16>
    %c256 = arith.constant 256 : index
    %c0_4 = arith.constant 0 : index
    %4 = vector.load %arg2[%c256, %c0_4] : memref<384x128xbf16, #tpu.memory_space<vmem>>, vector<128x128xbf16>
    %c0_5 = arith.constant 0 : index
    %c0_6 = arith.constant 0 : index
    %5 = vector.load %arg3[%c0_5, %c0_6] : memref<8x128xf32, #tpu.memory_space<vmem>>, vector<1x128xf32>
    %c1 = arith.constant 1 : index
    %c0_7 = arith.constant 0 : index
    %6 = vector.load %arg3[%c1, %c0_7] : memref<8x128xf32, #tpu.memory_space<vmem>>, vector<1x128xf32>
    %c2 = arith.constant 2 : index
    %c0_8 = arith.constant 0 : index
    %7 = vector.load %arg3[%c2, %c0_8] : memref<8x128xf32, #tpu.memory_space<vmem>>, vector<1x128xf32>
    %cst = arith.constant dense<0.000000e+00> : vector<8x128xf32>
    %8 = tpu.matmul %1, %2, %cst {dimension_numbers = #tpu.dot_dimension_numbers<[1], [0], [0], [1], [0, 0, 1, 1], [], []>} : vector<8x16xbf16>, vector<16x128xbf16>, vector<8x128xf32> -> vector<8x128xf32>
    %9 = vector.broadcast %5 : vector<1x128xf32> to vector<8x128xf32>
    %10 = arith.addf %8, %9 : vector<8x128xf32>
    %cst_9 = arith.constant 0.000000e+00 : f32
    %11 = vector.broadcast %cst_9 : f32 to vector<8x128xf32>
    %12 = arith.maximumf %10, %11 : vector<8x128xf32>
    %13 = arith.truncf %12 : vector<8x128xf32> to vector<8x128xbf16>
    %cst_10 = arith.constant dense<0.000000e+00> : vector<8x128xf32>
    %14 = tpu.matmul %13, %3, %cst_10 {dimension_numbers = #tpu.dot_dimension_numbers<[1], [0], [0], [1], [0, 0, 1, 1], [], []>} : vector<8x128xbf16>, vector<128x128xbf16>, vector<8x128xf32> -> vector<8x128xf32>
    %15 = vector.broadcast %6 : vector<1x128xf32> to vector<8x128xf32>
    %16 = arith.addf %14, %15 : vector<8x128xf32>
    %cst_11 = arith.constant 0.000000e+00 : f32
    %17 = vector.broadcast %cst_11 : f32 to vector<8x128xf32>
    %18 = arith.maximumf %16, %17 : vector<8x128xf32>
    %19 = arith.truncf %18 : vector<8x128xf32> to vector<8x128xbf16>
    %cst_12 = arith.constant dense<0.000000e+00> : vector<8x128xf32>
    %20 = tpu.matmul %19, %4, %cst_12 {dimension_numbers = #tpu.dot_dimension_numbers<[1], [0], [0], [1], [0, 0, 1, 1], [], []>} : vector<8x128xbf16>, vector<128x128xbf16>, vector<8x128xf32> -> vector<8x128xf32>
    %21 = vector.broadcast %7 : vector<1x128xf32> to vector<8x128xf32>
    %22 = arith.addf %20, %21 : vector<8x128xf32>
    %23 = math.tanh %22 : vector<8x128xf32>
    %cst_13 = arith.constant 2.000000e+00 : f32
    %24 = vector.broadcast %cst_13 : f32 to vector<8x128xf32>
    %25 = arith.mulf %23, %24 : vector<8x128xf32>
    %c0_14 = arith.constant 0 : index
    %c0_15 = arith.constant 0 : index
    %26 = vector.load %arg4[%c0_14, %c0_15] : memref<8x128xf32, #tpu.memory_space<vmem>>, vector<8x128xf32>
    tpu.vector_store %arg4[%c0_14, %c0_15], %25 {strides = array<i32>} : memref<8x128xf32, #tpu.memory_space<vmem>>, vector<8x128xf32>,
    return
  }
  func.func @transform_0(%arg0: i32) -> (i32, i32) {
    %c0_i32 = arith.constant 0 : i32
    %c0_i32_0 = arith.constant 0 : i32
    return %arg0, %c0_i32 : i32, i32
  }
  func.func @transform_1(%arg0: i32) -> (i32, i32) {
    %c0_i32 = arith.constant 0 : i32
    %c0_i32_0 = arith.constant 0 : i32
    %c0_i32_1 = arith.constant 0 : i32
    return %c0_i32, %c0_i32_0 : i32, i32
  }
  func.func @transform_2(%arg0: i32) -> (i32, i32) {
    %c0_i32 = arith.constant 0 : i32
    %c0_i32_0 = arith.constant 0 : i32
    %c0_i32_1 = arith.constant 0 : i32
    return %c0_i32, %c0_i32_0 : i32, i32
  }
  func.func @transform_3(%arg0: i32) -> (i32, i32) {
    %c0_i32 = arith.constant 0 : i32
    %c0_i32_0 = arith.constant 0 : i32
    return %arg0, %c0_i32 : i32, i32
  }
}

</mosaic_0001>

<bundles_post_ra>
// kernel: policy_net_forward.1
= control target key start
LH: loop header
LB: loop body
LE: loop exit
PB: predicated region body
PF: predicated region fallthrough
CT: control target
= control target key end

     0   :  { %8 = vsyncpa [#allocation3], 0  ;;  %s611_s0 = inlined_call_operand.hbm [shape: f32[8,16], index: 0, kind: input, shape index: {}]   ;;  %s612_s1 = inlined_call_operand.hbm [shape: bf16[384,128], index: 1, kind: input, shape index: {}]   ;;  %s613_s2 = inlined_call_operand.hbm [shape: f32[8,128], index: 2, kind: input, shape index: {}]   ;;  %s614_s3 = inlined_call_operand.vmem [shape: f32[8,128], index: 3, kind: output, shape index: {}]  }
   0x1   :  { %9 = vsyncpa [#allocation5], 0  ;;  %s525_s12 = smov [#allocation4]   ;;  %s455_s16 = scalar_lea.hbm %s612_s1, 3072 }
   0x2   :  { %s25_s13 = sshll.u32 %s525_s12, 4  ;;  %p456_p0 = scmp.ne.s32.totalorder %s612_s1, %s455_s16  ;;  %s26_s13 = int_to_ptr.vmem [resolvable:$true] %s25_s13 }
   0x3   :  { %p459_p1 = scmp.lt.u32.totalorder %s455_s16, %s612_s1 }
   0x5   :  { %p461_p2 = pnand %p459_p1, %p456_p0 }
   0x7   :  { %464 = shalt.err (!%p461_p2)
}
   0x8   :  { %s465_s21 = scalar_lea.vmem %s26_s13, 3072  ;;  %p470_p4 = scmp.lt.s32.totalorder %s26_s13, %s26_s13 }
   0x9   :  { %p466_p3 = scmp.ne.s32.totalorder %s26_s13, %s465_s21  ;;  %p471_p5 = scmp.lt.s32.totalorder %s465_s21, %s465_s21 }
   0xb   :  { %p472_p6 = por %p471_p5, %p470_p4 }
   0xd   :  { %p473_p7 = pnand %p472_p6, %p466_p3 }
   0xf   :  { %476 = shalt.err (!%p473_p7)
}
  0x10   :  { %s526_s22 = smov 64   ;;  %s527_s23 = smov 4  }
  0x11   :  { %31 = dma.hbm_to_vmem [thread:$0]  %s612_s1, 3072, %s26_s13, [#allocation5], %s526_s22, %s526_s22, %s527_s23  }
  0x12   :  { %s528_s26 = smov [#allocation2]   ;;  %s529_s28 = smov [#allocation6]  }
  0x13   :  { %s16_s27 = sshll.u32 %s528_s26, 4  ;;  %s38_s29 = sshll.u32 %s529_s28, 4  ;;  %s17_s27 = int_to_ptr.vmem [resolvable:$true] %s16_s27  ;;  %s39_s29 = int_to_ptr.vmem [resolvable:$true] %s38_s29 }
  0x14   :  { %s477_s5 = scalar_lea.hbm %s611_s0, 128 }
  0x15   :  { %p478_p8 = scmp.ne.s32.totalorder %s611_s0, %s477_s5  ;;  %p481_p9 = scmp.lt.u32.totalorder %s477_s5, %s611_s0 }
  0x17   :  { %p483_p10 = pnand %p481_p9, %p478_p8 }
  0x19   :  { %486 = shalt.err (!%p483_p10)
}
  0x1a   :  { %s487_s1 = scalar_lea.vmem %s17_s27, 128  ;;  %p492_p12 = scmp.lt.s32.totalorder %s17_s27, %s17_s27 }
  0x1b   :  { %p488_p11 = scmp.ne.s32.totalorder %s17_s27, %s487_s1  ;;  %p493_p13 = scmp.lt.s32.totalorder %s487_s1, %s487_s1 }
  0x1d   :  { %p494_p0 = por %p493_p13, %p492_p12 }
  0x1f   :  { %p495_p1 = pnand %p494_p0, %p488_p11 }
  0x21   :  { %498 = shalt.err (!%p495_p1)
}
  0x22   :  { %19 = dma.hbm_to_vmem [thread:$0]  %s611_s0, 128, %s17_s27, [#allocation3]  }
  0x23   :  { %s499_s14 = scalar_lea.hbm %s613_s2, 128 }
  0x24   :  { %p500_p2 = scmp.ne.s32.totalorder %s613_s2, %s499_s14  ;;  %p503_p3 = scmp.lt.u32.totalorder %s499_s14, %s613_s2 }
  0x26   :  { %p505_p4 = pnand %p503_p3, %p500_p2 }
  0x28   :  { %508 = shalt.err (!%p505_p4)
}
  0x29   :  { %s509_s19 = scalar_lea.vmem %s39_s29, 128  ;;  %p514_p6 = scmp.lt.s32.totalorder %s39_s29, %s39_s29 }
  0x2a   :  { %p510_p5 = scmp.ne.s32.totalorder %s39_s29, %s509_s19  ;;  %p515_p7 = scmp.lt.s32.totalorder %s509_s19, %s509_s19 }
  0x2c   :  { %p516_p8 = por %p515_p7, %p514_p6 }
  0x2e   :  { %p517_p9 = pnand %p516_p8, %p510_p5 }
  0x30   :  { %520 = shalt.err (!%p517_p9)
}
  0x31   :  { %41 = dma.hbm_to_vmem [thread:$0]  %s613_s2, 128, %s39_s29, [#allocation5]  }
  0x32   :  { %521 = dma.done.wait [#allocation3], 128  }
  0x33   :  { %522 = vsyncadd [#allocation3], 4294967168 }
  0x34   :  { %523 = dma.done.wait [#allocation5], 3200  }
  0x35   :  { %524 = vsyncadd [#allocation5], 4294964096  ;;  %v530_v0 = vmov 0.0   ;;  %vm531_vm0 = vmmov 0   ;;  %v436_v1 = vld [vmem:[#allocation4] sm:$0xff]   ;;  %v52_v2 = vld [vmem:[#allocation2] sm:$0xff] }
  0x36   :  { %383 = vmatprep.subr.bf16.mxu0 %v530_v0  ;;  %385 = vmatprep.mubr.msk.bf16.mxu0 %vm531_vm0, %v530_v0  ;;  %v53_v3 = vpack.c.bf16 %v52_v2, %v52_v2  ;;  %vm101_vm1 = vcmask 130048   ;;  %v437_v4 = vld [vmem:[#allocation4 + $0x40] sm:$0xff]   ;;  %v438_v5 = vld [vmem:[#allocation4 + $0x48] sm:$0xff]   ;;  %v439_v6 = vld [vmem:[#allocation4 + $0x50] sm:$0xff]  }
  0x37   :  { %389 = vmatprep.subr.bf16.mxu1 %v530_v0  ;;  %405 = vmatprep.mubr.msk.bf16.mxu1 %vm531_vm0, %v530_v0  ;;  %v440_v7 = vld [vmem:[#allocation4 + $0x58] sm:$0xff]   ;;  %v441_v8 = vld [vmem:[#allocation4 + $0x60] sm:$0xff]   ;;  %v442_v9 = vld [vmem:[#allocation4 + $0x68] sm:$0xff]  }
  0x38   :  { %384 = vmatpush3.bf16.msra.mxu0 %v436_v1  ;;  %390 = vmatpush3.bf16.msra.mxu1 %v437_v4  ;;  %v443_v10 = vld [vmem:[#allocation4 + $0x70] sm:$0xff]   ;;  %v444_v11 = vld [vmem:[#allocation4 + $0x78] sm:$0xff]   ;;  %v445_v12 = vld [vmem:[#allocation4 + $0x80] sm:$0xff]  }
  0x39   :  { %409 = vmatprep.subr.bf16.mxu0 %v530_v0  ;;  %391 = vmatprep.subr.bf16.mxu1 %v530_v0  ;;  %v446_v13 = vld [vmem:[#allocation4 + $0x88] sm:$0xff]   ;;  %v447_v14 = vld [vmem:[#allocation4 + $0x90] sm:$0xff]   ;;  %v448_v15 = vld [vmem:[#allocation4 + $0x98] sm:$0xff]  }
  0x3a   :  { %v449_v16 = vld [vmem:[#allocation4 + $0xa0] sm:$0xff]   ;;  %v450_v17 = vld [vmem:[#allocation4 + $0xa8] sm:$0xff]   ;;  %v451_v26 = vld [vmem:[#allocation4 + $0xb0] sm:$0xff]  }
  0x3b   :  { %386 = vmatmul.mubr.msk.bf16.vlgmr.msra.gmra.mrb[0].mxu0 %vm101_vm1, %v53_v3  ;;  %v342_v18 = vld [vmem:[#allocation6] ss:$0 sm:$0xff]  ;;  %v452_v27 = vld [vmem:[#allocation4 + $0xb8] sm:$0xff]   ;;  %v345_v28 = vld [vmem:[#allocation6 + $0x1] ss:$0 sm:$0xff] }
  0x3c   :  { %425 = vmatprep.mubr.msk.bf16.mxu0 %vm531_vm0, %v530_v0  ;;  %392 = vmatpush3.bf16.msra.mxu1 %v438_v5  ;;  %v354_v36 = vld [vmem:[#allocation6 + $0x2] ss:$0 sm:$0xff] }
  0x3d   :  { %393 = vmatprep.subr.bf16.mxu1 %v530_v0  ;;  %410 = vmatpush3.bf16.msra.mxu0 %v445_v12 }
  0x3e   :  { %411 = vmatprep.subr.bf16.mxu0 %v530_v0 }
  0x40   :  { %394 = vmatpush3.bf16.msra.mxu1 %v439_v6 }
  0x41   :  { %395 = vmatprep.subr.bf16.mxu1 %v530_v0  ;;  %412 = vmatpush3.bf16.msra.mxu0 %v446_v13 }
  0x42   :  { %413 = vmatprep.subr.bf16.mxu0 %v530_v0 }
  0x44   :  { %396 = vmatpush3.bf16.msra.mxu1 %v440_v7 }
  0x45   :  { %397 = vmatprep.subr.bf16.mxu1 %v530_v0  ;;  %414 = vmatpush3.bf16.msra.mxu0 %v447_v14 }
  0x46   :  { %415 = vmatprep.subr.bf16.mxu0 %v530_v0 }
  0x48   :  { %398 = vmatpush3.bf16.msra.mxu1 %v441_v8 }
  0x49   :  { %399 = vmatprep.subr.bf16.mxu1 %v530_v0  ;;  %416 = vmatpush3.bf16.msra.mxu0 %v448_v15 }
  0x4a   :  { %417 = vmatprep.subr.bf16.mxu0 %v530_v0 }
  0x4c   :  { %400 = vmatpush3.bf16.msra.mxu1 %v442_v9 }
  0x4d   :  { %401 = vmatprep.subr.bf16.mxu1 %v530_v0  ;;  %418 = vmatpush3.bf16.msra.mxu0 %v449_v16 }
  0x4e   :  { %419 = vmatprep.subr.bf16.mxu0 %v530_v0 }
  0x50   :  { %402 = vmatpush3.bf16.msra.mxu1 %v443_v10 }
  0x51   :  { %403 = vmatprep.subr.bf16.mxu1 %v530_v0  ;;  %420 = vmatpush3.bf16.msra.mxu0 %v450_v17 }
  0x52   :  { %421 = vmatprep.subr.bf16.mxu0 %v530_v0 }
  0x54   :  { %404 = vmatpush3.bf16.msra.mxu1 %v444_v11 }
  0x55   :  { %422 = vmatpush3.bf16.msra.mxu0 %v451_v26 }
  0x56   :  { %423 = vmatprep.subr.bf16.mxu0 %v530_v0 }
  0x59   :  { %424 = vmatpush3.bf16.msra.mxu0 %v452_v27 }
 0x10e   :  { %v139_v19 = vpop.f32.mrb[0].mxu0 }
 0x10f   :  { %v140_v20 = vadd.f32 %v342_v18, %v139_v19  ;;  %v387_v21 = vpop.f32.mrb[1].mxu0 }
 0x110   :  { %v142_v22 = vpop.f32.mrb[2].mxu0 }
 0x111   :  { %v145_v23 = vmax.f32 %v140_v20, 0.0  ;;  %v388_v24 = vpop.f32.mrb[3].mxu0 }
 0x113   :  { %v146_v25 = vpack.c.bf16 %v145_v23, %v145_v23 }
 0x115   :  { %406 = vmatmul.mubr.bf16.vlgmr.msra.gmra.mrb[0].mxu1 %v146_v25 }
 0x1e8   :  { %v233_v29 = vpop.f32.mrb[0].mxu1 }
 0x1e9   :  { %v234_v30 = vadd.f32 %v345_v28, %v233_v29  ;;  %v407_v31 = vpop.f32.mrb[1].mxu1 }
 0x1ea   :  { %v236_v32 = vpop.f32.mrb[2].mxu1 }
 0x1eb   :  { %v239_v33 = vmax.f32 %v234_v30, 0.0  ;;  %v408_v34 = vpop.f32.mrb[3].mxu1 }
 0x1ed   :  { %v240_v35 = vpack.c.bf16 %v239_v33, %v239_v33 }
 0x1ef   :  { %426 = vmatmul.mubr.bf16.vlgmr.msra.gmra.mrb[4].mxu0 %v240_v35 }
 0x2c2   :  { %v327_v37 = vpop.f32.mrb[4].mxu0 }
 0x2c3   :  { %v328_v38 = vadd.f32 %v354_v36, %v327_v37  ;;  %v427_v39 = vpop.f32.mrb[5].mxu0 }
 0x2c4   :  { %v330_v40 = vpop.f32.mrb[6].mxu0 }
 0x2c5   :  { %453 = vtanh.f32 %v328_v38  ;;  %v428_v41 = vpop.f32.mrb[7].mxu0 }
 0x2cf   :  { %v454_v42 = vpop.eup %453 }
 0x2d0   :  { %v334_v43 = vmul.f32 2.0, %v454_v42 }
 0x2d2   :  { %335 = vst [vmem:[%s614_s3] sm:$0xff] %v334_v43 }
 0x2d3   :  { %340 = vsyncpa [#allocation3], 1 }
 0x2d4   :  { %341 = vsyncpa [#allocation5], 1 }

</bundles_post_ra>
